<compile_context>
chip_gen: v7x
topology: tpu7x:2x2x1
jax: 0.10.0
libtpu: 0.0.40
codegen_flags: <defaults>
</compile_context>

<pallas_src>
import jax
import jax.numpy as jnp
from jax import lax
from jax.experimental import pallas as pl
from jax.experimental.pallas import tpu as pltpu

PROP_STEP = 8                 # args.prop_step default
APPLY_RELU_IN_LOOP = False    # args.relu default
BN_EPS = 1e-5


def gcn_kernel(x_ref, w1_ref, w2_ref, b_ref, a_ref, o_ref, h_scr):
    # ---- MLP (BatchNorm already folded into W1/b1): Linear -> ReLU -> Linear ----
    # TODO(synk): Dropout(p=0.05) is eval-mode identity; training-mode dropout
    # would use pltpu.prng_seed / pltpu.prng_random_bits.
    h = jnp.dot(x_ref[...], w1_ref[...], preferred_element_type=jnp.float32)  # [N, H]
    h = jnp.maximum(h + b_ref[0:1, :], 0.0)                                   # +b1, ReLU
    h = jnp.dot(h, w2_ref[...], preferred_element_type=jnp.float32)           # [N, H]
    h = h + b_ref[1:2, :]                                                     # +b2
    # Park h in VMEM so it is not live in vregs across the A-squaring chain.
    h_scr[...] = h

    a = a_ref[...]                                                            # [N, N]
    if not APPLY_RELU_IN_LOOP:
        # Repeated squaring: dependency chain of 4 matmuls instead of 8.
        a2 = jnp.dot(a, a, preferred_element_type=jnp.float32)                # A^2
        a4 = jnp.dot(a2, a2, preferred_element_type=jnp.float32)              # A^4
        a8 = jnp.dot(a4, a4, preferred_element_type=jnp.float32)              # A^8
        o_ref[...] = jnp.dot(a8, h_scr[...], preferred_element_type=jnp.float32)
    else:
        # ReLU inside the loop breaks linearity -> keep the explicit 8-step chain.
        h = h_scr[...]
        for _ in range(PROP_STEP):                    # fully unrolled, static bound
            h = jnp.maximum(h, 0.0)
            h = jnp.dot(a, h, preferred_element_type=jnp.float32)
        o_ref[...] = h


def prepare_params(w1, b1, gamma, beta, mean, var, w2, b2):
    """One-time (hoisted) parameter prep: fold BatchNorm1d(eval) into Linear1 and
    pack both biases into a single [2, H] operand. Not on the per-call hot path."""
    scale = gamma * lax.rsqrt(var + BN_EPS)          # [1, H]
    w1_f = w1 * scale                                # [F_in, H]
    b1_f = (b1 - mean) * scale + beta                # [1, H]
    b_packed = jnp.concatenate([b1_f, b2], axis=0)   # [2, H]  (row 0: b1', row 1: b2)
    return w1_f, w2, b_packed


@jax.jit
def gcn_no_para_forward(x, w1_f, w2, b_packed, a_norm):
    """x: [N, F_in] node features; a_norm: symmetric D^-1/2 (A+I) D^-1/2, [N, N].
    Returns node-major [N, H]."""
    N, F_in = x.shape
    H = w1_f.shape[1]

    if not APPLY_RELU_IN_LOOP:
        prop_flops = 3 * 2 * N * N * N + 2 * N * N * H        # squaring + apply
    else:
        prop_flops = PROP_STEP * 2 * N * N * H
    cost = pl.CostEstimate(
        flops=2 * N * F_in * H + 2 * N * H * H + prop_flops,
        transcendentals=0,
        bytes_accessed=4 * (N * F_in + F_in * H + H * H + 2 * H + N * N + N * H),
    )

    return pl.pallas_call(
        gcn_kernel,
        out_shape=jax.ShapeDtypeStruct((N, H), jnp.float32),
        scratch_shapes=[pltpu.VMEM((N, H), jnp.float32)],
        cost_estimate=cost,
    )(x, w1_f, w2, b_packed, a_norm)


def build_normalized_adjacency(key, n):
    """Random symmetric graph with self-loops, normalized D^-1/2 A D^-1/2.
    Symmetry is required by the kernel (A^T == A is assumed)."""
    raw = jax.random.bernoulli(key, p=0.05, shape=(n, n)).astype(jnp.float32)
    adj = jnp.maximum(raw, raw.T)
    adj = jnp.maximum(adj, jnp.eye(n, dtype=jnp.float32))  # self loops keep deg > 0
    deg = adj.sum(axis=1)
    d_inv_sqrt = 1.0 / jnp.sqrt(deg)
    return adj * d_inv_sqrt[:, None] * d_inv_sqrt[None, :]


if __name__ == "__main__":
    N = 128          # number of graph nodes
    F_IN = 16        # in_feats
    H = 32           # args.hidden default

    key = jax.random.PRNGKey(0)
    (k_x, k_w1, k_b1, k_g, k_bt, k_m, k_v, k_w2, k_b2, k_adj) = jax.random.split(key, 10)

    x = jax.random.normal(k_x, (N, F_IN), dtype=jnp.float32)

    # Deterministic parameter init (synthetic; PyTorch-like scaling)
    w1 = jax.random.normal(k_w1, (F_IN, H), dtype=jnp.float32) / jnp.sqrt(F_IN)
    b1 = jax.random.normal(k_b1, (1, H), dtype=jnp.float32) * 0.01
    gamma = 1.0 + 0.1 * jax.random.normal(k_g, (1, H), dtype=jnp.float32)
    beta = 0.1 * jax.random.normal(k_bt, (1, H), dtype=jnp.float32)
    running_mean = 0.05 * jax.random.normal(k_m, (1, H), dtype=jnp.float32)
    running_var = 1.0 + 0.1 * jnp.abs(jax.random.normal(k_v, (1, H), dtype=jnp.float32))
    w2 = jax.random.normal(k_w2, (H, H), dtype=jnp.float32) / jnp.sqrt(H)
    b2 = jax.random.normal(k_b2, (1, H), dtype=jnp.float32) * 0.01

    a_norm = build_normalized_adjacency(k_adj, N)

    # One-time parameter prep (outside the per-call hot path).
    w1_f, w2_f, b_packed = prepare_params(w1, b1, gamma, beta,
                                          running_mean, running_var, w2, b2)

    out = gcn_no_para_forward(x, w1_f, w2_f, b_packed, a_norm)
    jax.block_until_ready(out)

    # sanity: reference in plain JAX (unfolded BN, explicit 8-step propagation)
    h_ref = x @ w1 + b1
    h_ref = (h_ref - running_mean) * lax.rsqrt(running_var + BN_EPS) * gamma + beta
    h_ref = jnp.maximum(h_ref, 0.0)
    h_ref = h_ref @ w2 + b2
    for _ in range(PROP_STEP):
        if APPLY_RELU_IN_LOOP:
            h_ref = jnp.maximum(h_ref, 0.0)
        h_ref = a_norm @ h_ref

    assert out.shape == (N, H)
    assert jnp.allclose(out, h_ref, atol=1e-3, rtol=1e-3), \
        float(jnp.max(jnp.abs(out - h_ref)))

    print("KERNEL_OK")
</pallas_src>

<mosaic_0001>
module attributes {stable_mosaic.version = 11 : i64} {
  func.func @gcn_kernel(%arg0: memref<128x16xf32, #tpu.memory_space<vmem>>, %arg1: memref<16x32xf32, #tpu.memory_space<vmem>>, %arg2: memref<32x32xf32, #tpu.memory_space<vmem>>, %arg3: memref<2x32xf32, #tpu.memory_space<vmem>>, %arg4: memref<128x128xf32, #tpu.memory_space<vmem>>, %arg5: memref<128x32xf32, #tpu.memory_space<vmem>>, %arg6: memref<128x32xf32, #tpu.memory_space<vmem>>) attributes {dimension_semantics = [], scalar_prefetch = 0 : i64, scratch_operands = 1 : i64, tpu.core_type = #tpu.core_type<tc>} {
    %c0 = arith.constant 0 : index
    %c0_0 = arith.constant 0 : index
    %0 = vector.load %arg0[%c0, %c0_0] : memref<128x16xf32, #tpu.memory_space<vmem>>, vector<128x16xf32>
    %c0_1 = arith.constant 0 : index
    %c0_2 = arith.constant 0 : index
    %1 = vector.load %arg1[%c0_1, %c0_2] : memref<16x32xf32, #tpu.memory_space<vmem>>, vector<16x32xf32>
    %cst = arith.constant dense<0.000000e+00> : vector<128x32xf32>
    %2 = tpu.matmul %0, %1, %cst {dimension_numbers = #tpu.dot_dimension_numbers<[1], [0], [0], [1], [0, 0, 1, 1], [], []>} : vector<128x16xf32>, vector<16x32xf32>, vector<128x32xf32> -> vector<128x32xf32>
    %c0_3 = arith.constant 0 : index
    %c0_4 = arith.constant 0 : index
    %3 = vector.load %arg3[%c0_3, %c0_4] : memref<2x32xf32, #tpu.memory_space<vmem>>, vector<1x32xf32>
    %4 = vector.broadcast %3 : vector<1x32xf32> to vector<128x32xf32>
    %5 = arith.addf %2, %4 : vector<128x32xf32>
    %cst_5 = arith.constant 0.000000e+00 : f32
    %6 = vector.broadcast %cst_5 : f32 to vector<128x32xf32>
    %7 = arith.maximumf %5, %6 : vector<128x32xf32>
    %c0_6 = arith.constant 0 : index
    %c0_7 = arith.constant 0 : index
    %8 = vector.load %arg2[%c0_6, %c0_7] : memref<32x32xf32, #tpu.memory_space<vmem>>, vector<32x32xf32>
    %cst_8 = arith.constant dense<0.000000e+00> : vector<128x32xf32>
    %9 = tpu.matmul %7, %8, %cst_8 {dimension_numbers = #tpu.dot_dimension_numbers<[1], [0], [0], [1], [0, 0, 1, 1], [], []>} : vector<128x32xf32>, vector<32x32xf32>, vector<128x32xf32> -> vector<128x32xf32>
    %c1 = arith.constant 1 : index
    %c0_9 = arith.constant 0 : index
    %10 = vector.load %arg3[%c1, %c0_9] : memref<2x32xf32, #tpu.memory_space<vmem>>, vector<1x32xf32>
    %11 = vector.broadcast %10 : vector<1x32xf32> to vector<128x32xf32>
    %12 = arith.addf %9, %11 : vector<128x32xf32>
    %c0_10 = arith.constant 0 : index
    %c0_11 = arith.constant 0 : index
    %13 = vector.load %arg6[%c0_10, %c0_11] : memref<128x32xf32, #tpu.memory_space<vmem>>, vector<128x32xf32>
    tpu.vector_store %arg6[%c0_10, %c0_11], %12 {strides = array<i32>} : memref<128x32xf32, #tpu.memory_space<vmem>>, vector<128x32xf32>,
    %c0_12 = arith.constant 0 : index
    %c0_13 = arith.constant 0 : index
    %14 = vector.load %arg4[%c0_12, %c0_13] : memref<128x128xf32, #tpu.memory_space<vmem>>, vector<128x128xf32>
    %cst_14 = arith.constant dense<0.000000e+00> : vector<128x128xf32>
    %15 = tpu.matmul %14, %14, %cst_14 {dimension_numbers = #tpu.dot_dimension_numbers<[1], [0], [0], [1], [0, 0, 1, 1], [], []>} : vector<128x128xf32>, vector<128x128xf32>, vector<128x128xf32> -> vector<128x128xf32>
    %cst_15 = arith.constant dense<0.000000e+00> : vector<128x128xf32>
    %16 = tpu.matmul %15, %15, %cst_15 {dimension_numbers = #tpu.dot_dimension_numbers<[1], [0], [0], [1], [0, 0, 1, 1], [], []>} : vector<128x128xf32>, vector<128x128xf32>, vector<128x128xf32> -> vector<128x128xf32>
    %cst_16 = arith.constant dense<0.000000e+00> : vector<128x128xf32>
    %17 = tpu.matmul %16, %16, %cst_16 {dimension_numbers = #tpu.dot_dimension_numbers<[1], [0], [0], [1], [0, 0, 1, 1], [], []>} : vector<128x128xf32>, vector<128x128xf32>, vector<128x128xf32> -> vector<128x128xf32>
    %c0_17 = arith.constant 0 : index
    %c0_18 = arith.constant 0 : index
    %18 = vector.load %arg6[%c0_17, %c0_18] : memref<128x32xf32, #tpu.memory_space<vmem>>, vector<128x32xf32>
    %cst_19 = arith.constant dense<0.000000e+00> : vector<128x32xf32>
    %19 = tpu.matmul %17, %18, %cst_19 {dimension_numbers = #tpu.dot_dimension_numbers<[1], [0], [0], [1], [0, 0, 1, 1], [], []>} : vector<128x128xf32>, vector<128x32xf32>, vector<128x32xf32> -> vector<128x32xf32>
    %c0_20 = arith.constant 0 : index
    %c0_21 = arith.constant 0 : index
    %20 = vector.load %arg5[%c0_20, %c0_21] : memref<128x32xf32, #tpu.memory_space<vmem>>, vector<128x32xf32>
    tpu.vector_store %arg5[%c0_20, %c0_21], %19 {strides = array<i32>} : memref<128x32xf32, #tpu.memory_space<vmem>>, vector<128x32xf32>,
    return
  }
}

</mosaic_0001>

<bundles_post_ra>
// kernel: gcn_no_para_forward.1
= control target key start
LH: loop header
LB: loop body
LE: loop exit
PB: predicated region body
PF: predicated region fallthrough
CT: control target
= control target key end

     0   :  { %10 = vsyncpa [#allocation4], 0  ;;  %s1770_s18 = smov [#allocation3]   ;;  %s2077_s0 = inlined_call_operand.vmem [shape: f32[128,16], index: 0, kind: input, shape index: {}]   ;;  %s2078_s1 = inlined_call_operand.vmem [shape: f32[16,32], index: 1, kind: input, shape index: {}]   ;;  %s2079_s2 = inlined_call_operand.hbm [shape: f32[32,32], index: 2, kind: input, shape index: {}]   ;;  %s2080_s3 = inlined_call_operand.vmem [shape: f32[2,32], index: 3, kind: input, shape index: {}]   ;;  %s2081_s4 = inlined_call_operand.vmem [shape: f32[128,128], index: 4, kind: input, shape index: {}]   ;;  %s2082_s5 = inlined_call_operand.vmem [shape: f32[128,32], index: 5, kind: output, shape index: {}]  }
   0x1   :  { %s20_s19 = sshll.u32 %s1770_s18, 4  ;;  %s1746_s22 = scalar_lea.hbm %s2079_s2, 512  ;;  %s21_s19 = int_to_ptr.vmem [resolvable:$true] %s20_s19 }
   0x2   :  { %p1747_p0 = scmp.ne.s32.totalorder %s2079_s2, %s1746_s22  ;;  %p1750_p1 = scmp.lt.u32.totalorder %s1746_s22, %s2079_s2 }
   0x4   :  { %p1752_p2 = pnand %p1750_p1, %p1747_p0 }
   0x6   :  { %1755 = shalt.err (!%p1752_p2)
}
   0x7   :  { %s1756_s27 = scalar_lea.vmem %s21_s19, 512  ;;  %p1761_p4 = scmp.lt.s32.totalorder %s21_s19, %s21_s19 }
   0x8   :  { %p1757_p3 = scmp.ne.s32.totalorder %s21_s19, %s1756_s27  ;;  %p1762_p5 = scmp.lt.s32.totalorder %s1756_s27, %s1756_s27 }
   0xa   :  { %p1763_p6 = por %p1762_p5, %p1761_p4 }
   0xc   :  { %p1764_p7 = pnand %p1763_p6, %p1757_p3 }
   0xe   :  { %1767 = shalt.err (!%p1764_p7)
}
   0xf   :  { %s1771_s28 = smov 128   ;;  %s1772_s29 = smov 8  }
  0x10   :  { %26 = dma.hbm_to_vmem [thread:$0]  %s2079_s2, 512, %s21_s19, [#allocation4], %s1771_s28, %s1771_s28, %s1772_s29  }
  0x11   :  { %1768 = dma.done.wait [#allocation4], 512  }
  0x12   :  { %1769 = vsyncadd [#allocation4], 4294966784  ;;  %vm57_vm0 = vcmask 130048   ;;  %v50_v0 = vld [vmem:[%s2078_s1] sm:$0xff]  ;;  %v51_v1 = vld [vmem:[%s2078_s1 + $0x8] sm:$0xff]  ;;  %vm276_vm1 = vcmask 261120  }
  0x13   :  { %v34_v2 = vld [vmem:[%s2077_s0] sm:$0xff]  ;;  %v1603_v3 = vpack.c.bf16 %v51_v1, %v50_v0  ;;  %v1833_v5 = vld [vmem:[%s2081_s4 + $0x8] sm:$0xff]  ;;  %v1840_v7 = vld [vmem:[%s2081_s4 + $0x10] sm:$0xff] }
  0x14   :  { %1323 = vmatprep.mubr.msk.f32.mxu0 %vm57_vm0, %v34_v2  ;;  %v1828_v4 = vld [vmem:[%s2081_s4] sm:$0xff]  ;;  %v1845_v8 = vld [vmem:[%s2081_s4 + $0x18] sm:$0xff]  ;;  %v35_v9 = vld [vmem:[%s2077_s0 + $0x8] sm:$0xff] }
  0x15   :  { %v1615_v6 = vpack.c.bf16 %v1833_v5, %v1828_v4  ;;  %1604 = vmatprep.subr.bf16.mxu0 %v1603_v3  ;;  %v36_v10 = vld [vmem:[%s2077_s0 + $0x10] sm:$0xff]  ;;  %v1619_v11 = vpack.c.bf16 %v1845_v8, %v1840_v7  ;;  %v1858_v12 = vld [vmem:[%s2081_s4 + $0x20] sm:$0xff]  ;;  %v1863_v13 = vld [vmem:[%s2081_s4 + $0x28] sm:$0xff] }
  0x16   :  { %1606 = vmatpush3.bf16.msra.mxu0 %v1603_v3  ;;  %v37_v14 = vld [vmem:[%s2077_s0 + $0x18] sm:$0xff]  ;;  %v38_v15 = vld [vmem:[%s2077_s0 + $0x20] sm:$0xff]  ;;  %v1623_v16 = vpack.c.bf16 %v1863_v13, %v1858_v12  ;;  %v492_v17 = vld [vmem:[%s2081_s4 + $0x30] sm:$0xff] }
  0x17   :  { %1616 = vmatprep.subr.bf16.mxu0 %v1615_v6  ;;  %v493_v18 = vld [vmem:[%s2081_s4 + $0x38] sm:$0xff]  ;;  %v267_v19 = vld [vmem:[#allocation3] sm:$0xff]  ;;  %v268_v20 = vld [vmem:[#allocation3 + $0x8] sm:$0xff] }
  0x18   :  { %v39_v21 = vld [vmem:[%s2077_s0 + $0x28] sm:$0xff]  ;;  %v1607_v22 = vpack.c.bf16 %v268_v20, %v267_v19  ;;  %v40_v23 = vld [vmem:[%s2077_s0 + $0x30] sm:$0xff]  ;;  %v1627_v24 = vpack.c.bf16 %v493_v18, %v492_v17  ;;  %v494_v25 = vld [vmem:[%s2081_s4 + $0x40] sm:$0xff] }
  0x19   :  { %1324 = vmatmul.mubr.msk.f32.vlgmr.msra.gmra.mrb[0].mxu0 %vm57_vm0, %v35_v9  ;;  %v495_v26 = vld [vmem:[%s2081_s4 + $0x48] sm:$0xff]  ;;  %v41_v27 = vld [vmem:[%s2077_s0 + $0x38] sm:$0xff]  ;;  %v42_v28 = vld [vmem:[%s2077_s0 + $0x40] sm:$0xff] }
  0x1a   :  { %1618 = vmatpush3.bf16.msra.mxu0 %v1615_v6  ;;  %1326 = vmatprep.mubr.msk.f32.mxu0 %vm57_vm0, %v36_v10  ;;  %v1631_v29 = vpack.c.bf16 %v495_v26, %v494_v25  ;;  %v496_v30 = vld [vmem:[%s2081_s4 + $0x50] sm:$0xff]  ;;  %v497_v31 = vld [vmem:[%s2081_s4 + $0x58] sm:$0xff]  ;;  %v43_v32 = vld [vmem:[%s2077_s0 + $0x48] sm:$0xff] }
  0x1b   :  { %1620 = vmatprep.subr.bf16.mxu0 %v1619_v11  ;;  %1608 = vmatprep.subr.bf16.mxu1 %v1607_v22  ;;  %v44_v33 = vld [vmem:[%s2077_s0 + $0x50] sm:$0xff]  ;;  %v1635_v34 = vpack.c.bf16 %v497_v31, %v496_v30  ;;  %v498_v35 = vld [vmem:[%s2081_s4 + $0x60] sm:$0xff]  ;;  %v499_v36 = vld [vmem:[%s2081_s4 + $0x68] sm:$0xff] }
  0x1c   :  { %1610 = vmatpush3.bf16.msra.mxu1 %v1607_v22  ;;  %v45_v37 = vld [vmem:[%s2077_s0 + $0x58] sm:$0xff]  ;;  %v46_v38 = vld [vmem:[%s2077_s0 + $0x60] sm:$0xff]  ;;  %v1639_v39 = vpack.c.bf16 %v499_v36, %v498_v35  ;;  %v500_v40 = vld [vmem:[%s2081_s4 + $0x70] sm:$0xff] }
  0x1d   :  { %1327 = vmatmul.mubr.msk.f32.gmra.mrb[2].mxu0 %vm57_vm0, %v37_v14  ;;  %v501_v41 = vld [vmem:[%s2081_s4 + $0x78] sm:$0xff]  ;;  %v47_v42 = vld [vmem:[%s2077_s0 + $0x68] sm:$0xff]  ;;  %v48_v43 = vld [vmem:[%s2077_s0 + $0x70] sm:$0xff] }
  0x1e   :  { %1622 = vmatpush3.bf16.msra.mxu0 %v1619_v11  ;;  %1329 = vmatprep.mubr.msk.f32.mxu0 %vm57_vm0, %v38_v15  ;;  %v1643_v44 = vpack.c.bf16 %v501_v41, %v500_v40  ;;  %v49_v45 = vld [vmem:[%s2077_s0 + $0x78] sm:$0xff]  ;;  %v269_v46 = vld [vmem:[#allocation3 + $0x10] sm:$0xff]  ;;  %v1119_v49 = vld [vmem:[%s2080_s3] ss:$0 sm:$0xff] }
  0x1f   :  { %1624 = vmatprep.subr.bf16.mxu0 %v1623_v16  ;;  %v270_v47 = vld [vmem:[#allocation3 + $0x18] sm:$0xff] }
  0x20   :  { %v1611_v48 = vpack.c.bf16 %v270_v47, %v269_v46 }
  0x21   :  { %1330 = vmatmul.mubr.msk.f32.gmra.mrb[4].mxu0 %vm57_vm0, %v39_v21 }
  0x22   :  { %1626 = vmatpush3.bf16.msra.mxu0 %v1623_v16  ;;  %1332 = vmatprep.mubr.msk.f32.mxu0 %vm57_vm0, %v40_v23 }
  0x23   :  { %1628 = vmatprep.subr.bf16.mxu0 %v1627_v24  ;;  %1612 = vmatprep.subr.bf16.mxu1 %v1611_v48 }
  0x24   :  { %1614 = vmatpush3.bf16.msra.mxu1 %v1611_v48 }
  0x25   :  { %1333 = vmatmul.mubr.msk.f32.gmra.mrb[6].mxu0 %vm57_vm0, %v41_v27 }
  0x26   :  { %1630 = vmatpush3.bf16.msra.mxu0 %v1627_v24  ;;  %1335 = vmatprep.mubr.msk.f32.mxu0 %vm57_vm0, %v42_v28 }
  0x27   :  { %1632 = vmatprep.subr.bf16.mxu0 %v1631_v29 }
  0x29   :  { %1336 = vmatmul.mubr.msk.f32.gmra.mrb[8].mxu0 %vm57_vm0, %v43_v32 }
  0x2a   :  { %1634 = vmatpush3.bf16.msra.mxu0 %v1631_v29  ;;  %1338 = vmatprep.mubr.msk.f32.mxu0 %vm57_vm0, %v44_v33 }
  0x2b   :  { %1636 = vmatprep.subr.bf16.mxu0 %v1635_v34 }
  0x2d   :  { %1339 = vmatmul.mubr.msk.f32.gmra.mrb[10].mxu0 %vm57_vm0, %v45_v37 }
  0x2e   :  { %1638 = vmatpush3.bf16.msra.mxu0 %v1635_v34  ;;  %1341 = vmatprep.mubr.msk.f32.mxu0 %vm57_vm0, %v46_v38 }
  0x2f   :  { %1640 = vmatprep.subr.bf16.mxu0 %v1639_v39 }
  0x31   :  { %1342 = vmatmul.mubr.msk.f32.gmra.mrb[12].mxu0 %vm57_vm0, %v47_v42 }
  0x32   :  { %1642 = vmatpush3.bf16.msra.mxu0 %v1639_v39  ;;  %1344 = vmatprep.mubr.msk.f32.mxu0 %vm57_vm0, %v48_v43 }
  0x33   :  { %1644 = vmatprep.subr.bf16.mxu0 %v1643_v44 }
  0x35   :  { %1345 = vmatmul.mubr.msk.f32.gmra.mrb[14].mxu0 %vm57_vm0, %v49_v45 }
  0x36   :  { %1646 = vmatpush3.bf16.msra.mxu0 %v1643_v44  ;;  %1411 = vmatprep.mubr.f32.mxu0 %v1828_v4 }
  0x39   :  { %1412 = vmatmul.mubr.f32.vlgmr.msra.gmra.mrb[16].mxu0 %v1833_v5 }
  0x3a   :  { %1414 = vmatprep.mubr.f32.mxu0 %v1840_v7 }
  0x3d   :  { %1415 = vmatmul.mubr.f32.gmra.mrb[18].mxu0 %v1845_v8 }
  0x3e   :  { %1417 = vmatprep.mubr.f32.mxu0 %v1858_v12 }
  0x41   :  { %1418 = vmatmul.mubr.f32.gmra.mrb[20].mxu0 %v1863_v13 }
  0x42   :  { %1420 = vmatprep.mubr.f32.mxu0 %v492_v17 }
  0x45   :  { %1421 = vmatmul.mubr.f32.gmra.mrb[22].mxu0 %v493_v18 }
  0x46   :  { %1423 = vmatprep.mubr.f32.mxu0 %v494_v25 }
  0x49   :  { %1424 = vmatmul.mubr.f32.gmra.mrb[24].mxu0 %v495_v26 }
  0x4a   :  { %1426 = vmatprep.mubr.f32.mxu0 %v496_v30 }
  0x4d   :  { %1427 = vmatmul.mubr.f32.gmra.mrb[26].mxu0 %v497_v31 }
  0x4e   :  { %1429 = vmatprep.mubr.f32.mxu0 %v498_v35 }
  0x51   :  { %1430 = vmatmul.mubr.f32.gmra.mrb[28].mxu0 %v499_v36 }
  0x52   :  { %1432 = vmatprep.mubr.f32.mxu0 %v500_v40 }
  0x55   :  { %1433 = vmatmul.mubr.f32.gmra.mrb[30].mxu0 %v501_v41 }
  0xec   :  { %v1325_v50 = vpop.f32.mrb[0].mxu0 }
  0xed   :  { %v178_v51 = vadd.f32 %v1325_v50, %v1119_v49  ;;  %v172_v52 = vpop.f32.mrb[1].mxu0 }
  0xee   :  { %v173_v53 = vadd.f32 %v1119_v49, %v172_v52 }
  0xef   :  { %v252_v56 = vmax.f32 %v178_v51, 0.0 }
  0xf0   :  { %v251_v54 = vmax.f32 %v173_v53, 0.0  ;;  %v1328_v55 = vpop.f32.mrb[2].mxu0 }
  0xf1   :  { %v188_v57 = vadd.f32 %v1328_v55, %v1119_v49  ;;  %v182_v58 = vpop.f32.mrb[3].mxu0 }
  0xf2   :  { %v183_v59 = vadd.f32 %v1119_v49, %v182_v58  ;;  %1355 = vmatprep.mubr.msk.f32.mxu1 %vm276_vm1, %v251_v54  ;;  %v1979_v58 = vld [vmem:[%s2080_s3 + $0x1] ss:$0 sm:$0xff] }
  0xf3   :  { %1356 = vmatmul.mubr.msk.f32.vlgmr.msra.gmra.mrb[0].mxu1 %vm276_vm1, %v252_v56  ;;  %v254_v62 = vmax.f32 %v188_v57, 0.0 }
  0xf4   :  { %v253_v60 = vmax.f32 %v183_v59, 0.0  ;;  %v1331_v61 = vpop.f32.mrb[4].mxu0 }
  0xf5   :  { %v198_v63 = vadd.f32 %v1331_v61, %v1119_v49  ;;  %v192_v0 = vpop.f32.mrb[5].mxu0 }
  0xf6   :  { %v193_v1 = vadd.f32 %v1119_v49, %v192_v0  ;;  %1358 = vmatprep.mubr.msk.f32.mxu1 %vm276_vm1, %v253_v60 }
  0xf7   :  { %1359 = vmatmul.mubr.msk.f32.gmra.mrb[2].mxu1 %vm276_vm1, %v254_v62  ;;  %v256_v4 = vmax.f32 %v198_v63, 0.0 }
  0xf8   :  { %v255_v2 = vmax.f32 %v193_v1, 0.0  ;;  %v1334_v3 = vpop.f32.mrb[6].mxu0 }
  0xf9   :  { %v208_v5 = vadd.f32 %v1334_v3, %v1119_v49  ;;  %v202_v6 = vpop.f32.mrb[7].mxu0 }
  0xfa   :  { %v203_v7 = vadd.f32 %v1119_v49, %v202_v6  ;;  %1361 = vmatprep.mubr.msk.f32.mxu1 %vm276_vm1, %v255_v2 }
  0xfb   :  { %1362 = vmatmul.mubr.msk.f32.gmra.mrb[4].mxu1 %vm276_vm1, %v256_v4  ;;  %v258_v10 = vmax.f32 %v208_v5, 0.0 }
  0xfc   :  { %v257_v8 = vmax.f32 %v203_v7, 0.0  ;;  %v1337_v9 = vpop.f32.mrb[8].mxu0 }
  0xfd   :  { %v218_v11 = vadd.f32 %v1337_v9, %v1119_v49  ;;  %v212_v12 = vpop.f32.mrb[9].mxu0 }
  0xfe   :  { %v213_v13 = vadd.f32 %v1119_v49, %v212_v12  ;;  %1364 = vmatprep.mubr.msk.f32.mxu1 %vm276_vm1, %v257_v8 }
  0xff   :  { %1365 = vmatmul.mubr.msk.f32.gmra.mrb[6].mxu1 %vm276_vm1, %v258_v10  ;;  %v260_v16 = vmax.f32 %v218_v11, 0.0 }
 0x100   :  { %v259_v14 = vmax.f32 %v213_v13, 0.0  ;;  %v1340_v15 = vpop.f32.mrb[10].mxu0 }
 0x101   :  { %v228_v17 = vadd.f32 %v1340_v15, %v1119_v49  ;;  %v222_v18 = vpop.f32.mrb[11].mxu0 }
 0x102   :  { %v223_v19 = vadd.f32 %v1119_v49, %v222_v18  ;;  %1367 = vmatprep.mubr.msk.f32.mxu1 %vm276_vm1, %v259_v14 }
 0x103   :  { %1368 = vmatmul.mubr.msk.f32.gmra.mrb[8].mxu1 %vm276_vm1, %v260_v16  ;;  %v262_v22 = vmax.f32 %v228_v17, 0.0 }
 0x104   :  { %v261_v20 = vmax.f32 %v223_v19, 0.0  ;;  %v1343_v21 = vpop.f32.mrb[12].mxu0 }
 0x105   :  { %v238_v23 = vadd.f32 %v1343_v21, %v1119_v49  ;;  %v232_v24 = vpop.f32.mrb[13].mxu0 }
 0x106   :  { %v233_v25 = vadd.f32 %v1119_v49, %v232_v24  ;;  %1370 = vmatprep.mubr.msk.f32.mxu1 %vm276_vm1, %v261_v20 }
 0x107   :  { %1371 = vmatmul.mubr.msk.f32.gmra.mrb[10].mxu1 %vm276_vm1, %v262_v22  ;;  %v264_v28 = vmax.f32 %v238_v23, 0.0 }
 0x108   :  { %v263_v26 = vmax.f32 %v233_v25, 0.0  ;;  %v1346_v27 = vpop.f32.mrb[14].mxu0 }
 0x109   :  { %v248_v29 = vadd.f32 %v1346_v27, %v1119_v49  ;;  %v242_v30 = vpop.f32.mrb[15].mxu0 }
 0x10a   :  { %v243_v31 = vadd.f32 %v1119_v49, %v242_v30  ;;  %1373 = vmatprep.mubr.msk.f32.mxu1 %vm276_vm1, %v263_v26 }
 0x10b   :  { %1374 = vmatmul.mubr.msk.f32.gmra.mrb[12].mxu1 %vm276_vm1, %v264_v28  ;;  %v266_v34 = vmax.f32 %v248_v29, 0.0 }
 0x10c   :  { %v265_v32 = vmax.f32 %v243_v31, 0.0  ;;  %v1413_v33 = vpop.f32.mrb[16].mxu0 }
 0x10d   :  { %v568_v35 = vpop.f32.mrb[17].mxu0 }
 0x10e   :  { %v1647_v36 = vpack.c.bf16 %v1413_v33, %v568_v35  ;;  %1376 = vmatprep.mubr.msk.f32.mxu1 %vm276_vm1, %v265_v32 }
 0x10f   :  { %1377 = vmatmul.mubr.msk.f32.gmra.mrb[14].mxu1 %vm276_vm1, %v266_v34 }
 0x110   :  { %v1416_v37 = vpop.f32.mrb[18].mxu0  ;;  %1648 = vmatprep.subr.bf16.mxu1 %v1647_v36  ;;  %1467 = vmatprep.mubr.f32.mxu1 %v568_v35 }
 0x111   :  { %v578_v38 = vpop.f32.mrb[19].mxu0  ;;  %1650 = vmatpush3.bf16.msra.mxu1 %v1647_v36 }
 0x112   :  { %v1651_v39 = vpack.c.bf16 %v1416_v37, %v578_v38 }
 0x114   :  { %v1419_v40 = vpop.f32.mrb[20].mxu0  ;;  %1652 = vmatprep.subr.bf16.mxu1 %v1651_v39 }
 0x115   :  { %v588_v41 = vpop.f32.mrb[21].mxu0  ;;  %1654 = vmatpush3.bf16.msra.mxu1 %v1651_v39 }
 0x116   :  { %v1655_v42 = vpack.c.bf16 %v1419_v40, %v588_v41 }
 0x118   :  { %v1422_v43 = vpop.f32.mrb[22].mxu0  ;;  %1656 = vmatprep.subr.bf16.mxu1 %v1655_v42 }
 0x119   :  { %v598_v44 = vpop.f32.mrb[23].mxu0  ;;  %1658 = vmatpush3.bf16.msra.mxu1 %v1655_v42 }
 0x11a   :  { %v1659_v45 = vpack.c.bf16 %v1422_v43, %v598_v44 }
 0x11c   :  { %v1425_v46 = vpop.f32.mrb[24].mxu0  ;;  %1660 = vmatprep.subr.bf16.mxu1 %v1659_v45 }
 0x11d   :  { %v608_v47 = vpop.f32.mrb[25].mxu0  ;;  %1662 = vmatpush3.bf16.msra.mxu1 %v1659_v45 }
 0x11e   :  { %v1663_v48 = vpack.c.bf16 %v1425_v46, %v608_v47 }
 0x120   :  { %v1428_v49 = vpop.f32.mrb[26].mxu0  ;;  %1664 = vmatprep.subr.bf16.mxu1 %v1663_v48 }
 0x121   :  { %v618_v50 = vpop.f32.mrb[27].mxu0  ;;  %1666 = vmatpush3.bf16.msra.mxu1 %v1663_v48 }
 0x122   :  { %v1667_v51 = vpack.c.bf16 %v1428_v49, %v618_v50 }
 0x124   :  { %v1431_v52 = vpop.f32.mrb[28].mxu0  ;;  %1668 = vmatprep.subr.bf16.mxu1 %v1667_v51 }
 0x125   :  { %v628_v53 = vpop.f32.mrb[29].mxu0  ;;  %1670 = vmatpush3.bf16.msra.mxu1 %v1667_v51 }
 0x126   :  { %v1671_v54 = vpack.c.bf16 %v1431_v52, %v628_v53 }
 0x128   :  { %v1434_v55 = vpop.f32.mrb[30].mxu0  ;;  %1672 = vmatprep.subr.bf16.mxu1 %v1671_v54 }
 0x129   :  { %v638_v56 = vpop.f32.mrb[31].mxu0  ;;  %1674 = vmatpush3.bf16.msra.mxu1 %v1671_v54 }
 0x12a   :  { %v1675_v57 = vpack.c.bf16 %v1434_v55, %v638_v56 }
 0x12c   :  { %1676 = vmatprep.subr.bf16.mxu1 %v1675_v57 }
 0x12d   :  { %1678 = vmatpush3.bf16.msra.mxu1 %v1675_v57 }
 0x130   :  { %1468 = vmatmul.mubr.f32.vlgmr.msra.gmra.mrb[16].mxu1 %v1413_v33 }
 0x131   :  { %1470 = vmatprep.mubr.f32.mxu1 %v578_v38 }
 0x134   :  { %1471 = vmatmul.mubr.f32.gmra.mrb[18].mxu1 %v1416_v37 }
 0x135   :  { %1473 = vmatprep.mubr.f32.mxu1 %v588_v41 }
 0x138   :  { %1474 = vmatmul.mubr.f32.gmra.mrb[20].mxu1 %v1419_v40 }
 0x139   :  { %1476 = vmatprep.mubr.f32.mxu1 %v598_v44 }
 0x13c   :  { %1477 = vmatmul.mubr.f32.gmra.mrb[22].mxu1 %v1422_v43 }
 0x13d   :  { %1479 = vmatprep.mubr.f32.mxu1 %v608_v47 }
 0x140   :  { %1480 = vmatmul.mubr.f32.gmra.mrb[24].mxu1 %v1425_v46 }
 0x141   :  { %1482 = vmatprep.mubr.f32.mxu1 %v618_v50 }
 0x144   :  { %1483 = vmatmul.mubr.f32.gmra.mrb[26].mxu1 %v1428_v49 }
 0x145   :  { %1485 = vmatprep.mubr.f32.mxu1 %v628_v53 }
 0x148   :  { %1486 = vmatmul.mubr.f32.gmra.mrb[28].mxu1 %v1431_v52 }
 0x149   :  { %1488 = vmatprep.mubr.f32.mxu1 %v638_v56 }
 0x14c   :  { %1489 = vmatmul.mubr.f32.gmra.mrb[30].mxu1 %v1434_v55 }
 0x1c6   :  { %v1357_v59 = vpop.f32.mrb[0].mxu1 }
 0x1c7   :  { %v397_v60 = vadd.f32 %v1357_v59, %v1979_v58  ;;  %v391_v61 = vpop.f32.mrb[1].mxu1 }
 0x1c8   :  { %v392_v62 = vadd.f32 %v1979_v58, %v391_v61 }
 0x1c9   :  { %471 = vst.msk [vmem:[#allocation2 + $0x8] sm:$0xff] %vm276_vm1, %v397_v60 }
 0x1ca   :  { %470 = vst.msk [vmem:[#allocation2] sm:$0xff] %vm276_vm1, %v392_v62  ;;  %v1360_v63 = vpop.f32.mrb[2].mxu1 }
 0x1cb   :  { %v407_v0 = vadd.f32 %v1360_v63, %v1979_v58  ;;  %v401_v1 = vpop.f32.mrb[3].mxu1 }
 0x1cc   :  { %v402_v2 = vadd.f32 %v1979_v58, %v401_v1 }
 0x1cd   :  { %473 = vst.msk [vmem:[#allocation2 + $0x18] sm:$0xff] %vm276_vm1, %v407_v0 }
 0x1ce   :  { %472 = vst.msk [vmem:[#allocation2 + $0x10] sm:$0xff] %vm276_vm1, %v402_v2  ;;  %v1363_v3 = vpop.f32.mrb[4].mxu1 }
 0x1cf   :  { %v417_v4 = vadd.f32 %v1363_v3, %v1979_v58  ;;  %v411_v5 = vpop.f32.mrb[5].mxu1 }
 0x1d0   :  { %v412_v6 = vadd.f32 %v1979_v58, %v411_v5  ;;  %v938_v7 = vld [vmem:[#allocation2 + $0x8] sm:$0xff] }
 0x1d1   :  { %475 = vst.msk [vmem:[#allocation2 + $0x28] sm:$0xff] %vm276_vm1, %v417_v4  ;;  %v937_v8 = vld [vmem:[#allocation2] sm:$0xff] }
 0x1d2   :  { %474 = vst.msk [vmem:[#allocation2 + $0x20] sm:$0xff] %vm276_vm1, %v412_v6  ;;  %v1366_v9 = vpop.f32.mrb[6].mxu1  ;;  %v1711_v10 = vpack.c.bf16 %v938_v7, %v937_v8 }
 0x1d3   :  { %v427_v11 = vadd.f32 %v1366_v9, %v1979_v58  ;;  %v421_v12 = vpop.f32.mrb[7].mxu1 }
 0x1d4   :  { %v422_v13 = vadd.f32 %v1979_v58, %v421_v12  ;;  %1712 = vmatprep.subr.bf16.mxu1 %v1711_v10  ;;  %v940_v14 = vld [vmem:[#allocation2 + $0x18] sm:$0xff] }
 0x1d5   :  { %477 = vst.msk [vmem:[#allocation2 + $0x38] sm:$0xff] %vm276_vm1, %v427_v11  ;;  %1714 = vmatpush3.bf16.msra.mxu1 %v1711_v10  ;;  %v939_v15 = vld [vmem:[#allocation2 + $0x10] sm:$0xff] }
 0x1d6   :  { %476 = vst.msk [vmem:[#allocation2 + $0x30] sm:$0xff] %vm276_vm1, %v422_v13  ;;  %v1369_v16 = vpop.f32.mrb[8].mxu1  ;;  %v1715_v17 = vpack.c.bf16 %v940_v14, %v939_v15 }
 0x1d7   :  { %v437_v18 = vadd.f32 %v1369_v16, %v1979_v58  ;;  %v431_v19 = vpop.f32.mrb[9].mxu1 }
 0x1d8   :  { %v432_v20 = vadd.f32 %v1979_v58, %v431_v19  ;;  %1716 = vmatprep.subr.bf16.mxu1 %v1715_v17  ;;  %v942_v21 = vld [vmem:[#allocation2 + $0x28] sm:$0xff] }
 0x1d9   :  { %479 = vst.msk [vmem:[#allocation2 + $0x48] sm:$0xff] %vm276_vm1, %v437_v18  ;;  %1718 = vmatpush3.bf16.msra.mxu1 %v1715_v17  ;;  %v941_v22 = vld [vmem:[#allocation2 + $0x20] sm:$0xff] }
 0x1da   :  { %478 = vst.msk [vmem:[#allocation2 + $0x40] sm:$0xff] %vm276_vm1, %v432_v20  ;;  %v1372_v23 = vpop.f32.mrb[10].mxu1  ;;  %v1719_v24 = vpack.c.bf16 %v942_v21, %v941_v22 }
 0x1db   :  { %v447_v25 = vadd.f32 %v1372_v23, %v1979_v58  ;;  %v441_v26 = vpop.f32.mrb[11].mxu1 }
 0x1dc   :  { %v442_v27 = vadd.f32 %v1979_v58, %v441_v26  ;;  %1720 = vmatprep.subr.bf16.mxu1 %v1719_v24  ;;  %v944_v28 = vld [vmem:[#allocation2 + $0x38] sm:$0xff] }
 0x1dd   :  { %481 = vst.msk [vmem:[#allocation2 + $0x58] sm:$0xff] %vm276_vm1, %v447_v25  ;;  %1722 = vmatpush3.bf16.msra.mxu1 %v1719_v24  ;;  %v943_v29 = vld [vmem:[#allocation2 + $0x30] sm:$0xff] }
 0x1de   :  { %480 = vst.msk [vmem:[#allocation2 + $0x50] sm:$0xff] %vm276_vm1, %v442_v27  ;;  %v1375_v30 = vpop.f32.mrb[12].mxu1  ;;  %v1723_v31 = vpack.c.bf16 %v944_v28, %v943_v29 }
 0x1df   :  { %v457_v32 = vadd.f32 %v1375_v30, %v1979_v58  ;;  %v451_v33 = vpop.f32.mrb[13].mxu1 }
 0x1e0   :  { %v452_v34 = vadd.f32 %v1979_v58, %v451_v33  ;;  %1724 = vmatprep.subr.bf16.mxu1 %v1723_v31  ;;  %v946_v35 = vld [vmem:[#allocation2 + $0x48] sm:$0xff] }
 0x1e1   :  { %483 = vst.msk [vmem:[#allocation2 + $0x68] sm:$0xff] %vm276_vm1, %v457_v32  ;;  %1726 = vmatpush3.bf16.msra.mxu1 %v1723_v31  ;;  %v945_v36 = vld [vmem:[#allocation2 + $0x40] sm:$0xff] }
 0x1e2   :  { %482 = vst.msk [vmem:[#allocation2 + $0x60] sm:$0xff] %vm276_vm1, %v452_v34  ;;  %v1378_v37 = vpop.f32.mrb[14].mxu1  ;;  %v1727_v38 = vpack.c.bf16 %v946_v35, %v945_v36 }
 0x1e3   :  { %v467_v39 = vadd.f32 %v1378_v37, %v1979_v58  ;;  %v461_v40 = vpop.f32.mrb[15].mxu1 }
 0x1e4   :  { %v462_v41 = vadd.f32 %v1979_v58, %v461_v40  ;;  %1728 = vmatprep.subr.bf16.mxu1 %v1727_v38  ;;  %v948_v42 = vld [vmem:[#allocation2 + $0x58] sm:$0xff] }
 0x1e5   :  { %485 = vst.msk [vmem:[#allocation2 + $0x78] sm:$0xff] %vm276_vm1, %v467_v39  ;;  %1730 = vmatpush3.bf16.msra.mxu1 %v1727_v38  ;;  %v947_v43 = vld [vmem:[#allocation2 + $0x50] sm:$0xff] }
 0x1e6   :  { %484 = vst.msk [vmem:[#allocation2 + $0x70] sm:$0xff] %vm276_vm1, %v462_v41  ;;  %v1731_v44 = vpack.c.bf16 %v948_v42, %v947_v43 }
 0x1e8   :  { %1732 = vmatprep.subr.bf16.mxu1 %v1731_v44  ;;  %v950_v45 = vld [vmem:[#allocation2 + $0x68] sm:$0xff] }
 0x1e9   :  { %1734 = vmatpush3.bf16.msra.mxu1 %v1731_v44  ;;  %v949_v46 = vld [vmem:[#allocation2 + $0x60] sm:$0xff] }
 0x1ea   :  { %v1735_v47 = vpack.c.bf16 %v950_v45, %v949_v46 }
 0x1ec   :  { %1736 = vmatprep.subr.bf16.mxu1 %v1735_v47  ;;  %v952_v48 = vld [vmem:[#allocation2 + $0x78] sm:$0xff] }
 0x1ed   :  { %1738 = vmatpush3.bf16.msra.mxu1 %v1735_v47  ;;  %v951_v49 = vld [vmem:[#allocation2 + $0x70] sm:$0xff] }
 0x1ee   :  { %v1739_v50 = vpack.c.bf16 %v952_v48, %v951_v49 }
 0x1f0   :  { %1740 = vmatprep.subr.bf16.mxu1 %v1739_v50 }
 0x1f1   :  { %1742 = vmatpush3.bf16.msra.mxu1 %v1739_v50 }
 0x203   :  { %v1469_v51 = vpop.f32.mrb[16].mxu1 }
 0x204   :  { %v713_v52 = vpop.f32.mrb[17].mxu1 }
 0x205   :  { %v1679_v53 = vpack.c.bf16 %v1469_v51, %v713_v52  ;;  %1523 = vmatprep.mubr.f32.mxu0 %v713_v52 }
 0x207   :  { %v1472_v54 = vpop.f32.mrb[18].mxu1  ;;  %1680 = vmatprep.subr.bf16.mxu0 %v1679_v53 }
 0x208   :  { %v723_v55 = vpop.f32.mrb[19].mxu1  ;;  %1682 = vmatpush3.bf16.msra.mxu0 %v1679_v53 }
 0x209   :  { %v1683_v56 = vpack.c.bf16 %v1472_v54, %v723_v55 }
 0x20b   :  { %v1475_v57 = vpop.f32.mrb[20].mxu1  ;;  %1684 = vmatprep.subr.bf16.mxu0 %v1683_v56 }
 0x20c   :  { %v733_v58 = vpop.f32.mrb[21].mxu1  ;;  %1686 = vmatpush3.bf16.msra.mxu0 %v1683_v56 }
 0x20d   :  { %v1687_v59 = vpack.c.bf16 %v1475_v57, %v733_v58 }
 0x20f   :  { %v1478_v60 = vpop.f32.mrb[22].mxu1  ;;  %1688 = vmatprep.subr.bf16.mxu0 %v1687_v59 }
 0x210   :  { %v743_v61 = vpop.f32.mrb[23].mxu1  ;;  %1690 = vmatpush3.bf16.msra.mxu0 %v1687_v59 }
 0x211   :  { %v1691_v62 = vpack.c.bf16 %v1478_v60, %v743_v61 }
 0x213   :  { %v1481_v63 = vpop.f32.mrb[24].mxu1  ;;  %1692 = vmatprep.subr.bf16.mxu0 %v1691_v62 }
 0x214   :  { %v753_v0 = vpop.f32.mrb[25].mxu1  ;;  %1694 = vmatpush3.bf16.msra.mxu0 %v1691_v62 }
 0x215   :  { %v1695_v1 = vpack.c.bf16 %v1481_v63, %v753_v0 }
 0x217   :  { %v1484_v2 = vpop.f32.mrb[26].mxu1  ;;  %1696 = vmatprep.subr.bf16.mxu0 %v1695_v1 }
 0x218   :  { %v763_v3 = vpop.f32.mrb[27].mxu1  ;;  %1698 = vmatpush3.bf16.msra.mxu0 %v1695_v1 }
 0x219   :  { %v1699_v4 = vpack.c.bf16 %v1484_v2, %v763_v3 }
 0x21b   :  { %v1487_v5 = vpop.f32.mrb[28].mxu1  ;;  %1700 = vmatprep.subr.bf16.mxu0 %v1699_v4 }
 0x21c   :  { %v773_v6 = vpop.f32.mrb[29].mxu1  ;;  %1702 = vmatpush3.bf16.msra.mxu0 %v1699_v4 }
 0x21d   :  { %v1703_v7 = vpack.c.bf16 %v1487_v5, %v773_v6 }
 0x21f   :  { %v1490_v8 = vpop.f32.mrb[30].mxu1  ;;  %1704 = vmatprep.subr.bf16.mxu0 %v1703_v7 }
 0x220   :  { %v783_v9 = vpop.f32.mrb[31].mxu1  ;;  %1706 = vmatpush3.bf16.msra.mxu0 %v1703_v7 }
 0x221   :  { %v1707_v10 = vpack.c.bf16 %v1490_v8, %v783_v9 }
 0x223   :  { %1708 = vmatprep.subr.bf16.mxu0 %v1707_v10 }
 0x224   :  { %1710 = vmatpush3.bf16.msra.mxu0 %v1707_v10 }
 0x227   :  { %1524 = vmatmul.mubr.f32.vlgmr.msra.gmra.mrb[32].mxu0 %v1469_v51 }
 0x228   :  { %1526 = vmatprep.mubr.f32.mxu0 %v723_v55 }
 0x22b   :  { %1527 = vmatmul.mubr.f32.gmra.mrb[34].mxu0 %v1472_v54 }
 0x22c   :  { %1529 = vmatprep.mubr.f32.mxu0 %v733_v58 }
 0x22f   :  { %1530 = vmatmul.mubr.f32.gmra.mrb[36].mxu0 %v1475_v57 }
 0x230   :  { %1532 = vmatprep.mubr.f32.mxu0 %v743_v61 }
 0x233   :  { %1533 = vmatmul.mubr.f32.gmra.mrb[38].mxu0 %v1478_v60 }
 0x234   :  { %1535 = vmatprep.mubr.f32.mxu0 %v753_v0 }
 0x237   :  { %1536 = vmatmul.mubr.f32.gmra.mrb[40].mxu0 %v1481_v63 }
 0x238   :  { %1538 = vmatprep.mubr.f32.mxu0 %v763_v3 }
 0x23b   :  { %1539 = vmatmul.mubr.f32.gmra.mrb[42].mxu0 %v1484_v2 }
 0x23c   :  { %1541 = vmatprep.mubr.f32.mxu0 %v773_v6 }
 0x23f   :  { %1542 = vmatmul.mubr.f32.gmra.mrb[44].mxu0 %v1487_v5 }
 0x240   :  { %1544 = vmatprep.mubr.f32.mxu0 %v783_v9 }
 0x243   :  { %1545 = vmatmul.mubr.f32.gmra.mrb[46].mxu0 %v1490_v8 }
 0x2fa   :  { %v1525_v11 = vpop.f32.mrb[32].mxu0 }
 0x2fb   :  { %v858_v12 = vpop.f32.mrb[33].mxu0 }
 0x2fc   :  { %1579 = vmatprep.mubr.f32.mxu1 %v858_v12 }
 0x2fd   :  { %1580 = vmatmul.mubr.f32.vlgmr.msra.gmra.mrb[32].mxu1 %v1525_v11 }
 0x2fe   :  { %v1528_v13 = vpop.f32.mrb[34].mxu0 }
 0x2ff   :  { %v868_v14 = vpop.f32.mrb[35].mxu0 }
 0x300   :  { %1582 = vmatprep.mubr.f32.mxu1 %v868_v14 }
 0x301   :  { %1583 = vmatmul.mubr.f32.gmra.mrb[34].mxu1 %v1528_v13 }
 0x302   :  { %v1531_v15 = vpop.f32.mrb[36].mxu0 }
 0x303   :  { %v878_v16 = vpop.f32.mrb[37].mxu0 }
 0x304   :  { %1585 = vmatprep.mubr.f32.mxu1 %v878_v16 }
 0x305   :  { %1586 = vmatmul.mubr.f32.gmra.mrb[36].mxu1 %v1531_v15 }
 0x306   :  { %v1534_v17 = vpop.f32.mrb[38].mxu0 }
 0x307   :  { %v888_v18 = vpop.f32.mrb[39].mxu0 }
 0x308   :  { %1588 = vmatprep.mubr.f32.mxu1 %v888_v18 }
 0x309   :  { %1589 = vmatmul.mubr.f32.gmra.mrb[38].mxu1 %v1534_v17 }
 0x30a   :  { %v1537_v19 = vpop.f32.mrb[40].mxu0 }
 0x30b   :  { %v898_v20 = vpop.f32.mrb[41].mxu0 }
 0x30c   :  { %1591 = vmatprep.mubr.f32.mxu1 %v898_v20 }
 0x30d   :  { %1592 = vmatmul.mubr.f32.gmra.mrb[40].mxu1 %v1537_v19 }
 0x30e   :  { %v1540_v21 = vpop.f32.mrb[42].mxu0 }
 0x30f   :  { %v908_v22 = vpop.f32.mrb[43].mxu0 }
 0x310   :  { %1594 = vmatprep.mubr.f32.mxu1 %v908_v22 }
 0x311   :  { %1595 = vmatmul.mubr.f32.gmra.mrb[42].mxu1 %v1540_v21 }
 0x312   :  { %v1543_v23 = vpop.f32.mrb[44].mxu0 }
 0x313   :  { %v918_v24 = vpop.f32.mrb[45].mxu0 }
 0x314   :  { %1597 = vmatprep.mubr.f32.mxu1 %v918_v24 }
 0x315   :  { %1598 = vmatmul.mubr.f32.gmra.mrb[44].mxu1 %v1543_v23 }
 0x316   :  { %v1546_v25 = vpop.f32.mrb[46].mxu0 }
 0x317   :  { %v928_v26 = vpop.f32.mrb[47].mxu0 }
 0x318   :  { %1600 = vmatprep.mubr.f32.mxu1 %v928_v26 }
 0x319   :  { %1601 = vmatmul.mubr.f32.gmra.mrb[46].mxu1 %v1546_v25 }
 0x3d0   :  { %v1581_v27 = vpop.f32.mrb[32].mxu1 }
 0x3d1   :  { %1099 = vst.msk [vmem:[%s2082_s5 + $0x8] sm:$0xff] %vm276_vm1, %v1581_v27  ;;  %v1019_v28 = vpop.f32.mrb[33].mxu1 }
 0x3d2   :  { %1098 = vst.msk [vmem:[%s2082_s5] sm:$0xff] %vm276_vm1, %v1019_v28 }
 0x3d4   :  { %v1584_v29 = vpop.f32.mrb[34].mxu1 }
 0x3d5   :  { %1101 = vst.msk [vmem:[%s2082_s5 + $0x18] sm:$0xff] %vm276_vm1, %v1584_v29  ;;  %v1029_v30 = vpop.f32.mrb[35].mxu1 }
 0x3d6   :  { %1100 = vst.msk [vmem:[%s2082_s5 + $0x10] sm:$0xff] %vm276_vm1, %v1029_v30 }
 0x3d8   :  { %v1587_v31 = vpop.f32.mrb[36].mxu1 }
 0x3d9   :  { %1103 = vst.msk [vmem:[%s2082_s5 + $0x28] sm:$0xff] %vm276_vm1, %v1587_v31  ;;  %v1039_v32 = vpop.f32.mrb[37].mxu1 }
 0x3da   :  { %1102 = vst.msk [vmem:[%s2082_s5 + $0x20] sm:$0xff] %vm276_vm1, %v1039_v32 }
 0x3dc   :  { %v1590_v33 = vpop.f32.mrb[38].mxu1 }
 0x3dd   :  { %1105 = vst.msk [vmem:[%s2082_s5 + $0x38] sm:$0xff] %vm276_vm1, %v1590_v33  ;;  %v1049_v34 = vpop.f32.mrb[39].mxu1 }
 0x3de   :  { %1104 = vst.msk [vmem:[%s2082_s5 + $0x30] sm:$0xff] %vm276_vm1, %v1049_v34 }
 0x3e0   :  { %v1593_v35 = vpop.f32.mrb[40].mxu1 }
 0x3e1   :  { %1107 = vst.msk [vmem:[%s2082_s5 + $0x48] sm:$0xff] %vm276_vm1, %v1593_v35  ;;  %v1059_v36 = vpop.f32.mrb[41].mxu1 }
 0x3e2   :  { %1106 = vst.msk [vmem:[%s2082_s5 + $0x40] sm:$0xff] %vm276_vm1, %v1059_v36 }
 0x3e4   :  { %v1596_v37 = vpop.f32.mrb[42].mxu1 }
 0x3e5   :  { %1109 = vst.msk [vmem:[%s2082_s5 + $0x58] sm:$0xff] %vm276_vm1, %v1596_v37  ;;  %v1069_v38 = vpop.f32.mrb[43].mxu1 }
 0x3e6   :  { %1108 = vst.msk [vmem:[%s2082_s5 + $0x50] sm:$0xff] %vm276_vm1, %v1069_v38 }
 0x3e8   :  { %v1599_v39 = vpop.f32.mrb[44].mxu1 }
 0x3e9   :  { %1111 = vst.msk [vmem:[%s2082_s5 + $0x68] sm:$0xff] %vm276_vm1, %v1599_v39  ;;  %v1079_v40 = vpop.f32.mrb[45].mxu1 }
 0x3ea   :  { %1110 = vst.msk [vmem:[%s2082_s5 + $0x60] sm:$0xff] %vm276_vm1, %v1079_v40 }
 0x3ec   :  { %v1602_v41 = vpop.f32.mrb[46].mxu1 }
 0x3ed   :  { %1113 = vst.msk [vmem:[%s2082_s5 + $0x78] sm:$0xff] %vm276_vm1, %v1602_v41  ;;  %v1089_v42 = vpop.f32.mrb[47].mxu1 }
 0x3ee   :  { %1112 = vst.msk [vmem:[%s2082_s5 + $0x70] sm:$0xff] %vm276_vm1, %v1089_v42 }
 0x3ef   :  { %1118 = vsyncpa [#allocation4], 1 }

</bundles_post_ra>
